<compile_context>
chip_gen: v6e
topology: v6e:2x2x1
jax: 0.10.0
libtpu: 0.0.40
codegen_flags: <defaults>
</compile_context>

<pallas_src>
import functools
import math

import jax
import jax.numpy as jnp
from jax import lax
from jax.experimental import pallas as pl
from jax.experimental.pallas import tpu as pltpu

EPS = 1e-7          # float32 eps used by the reference hyperboloid model
MIN_NORM = 1e-15
_MIN_NORM_SQ = MIN_NORM * MIN_NORM

_WINDOW_BUDGET_BYTES = 8 << 20    # double-buffered in+out windows (f32-sized)
_VMEM_LIMIT_BYTES = 24 << 20      # explicit scoped-VMEM limit, leaves headroom
                                  # for Mosaic temporaries on every generation
_FEATURE_MAJOR_MAX_D = 256        # lane-dense transposed layout pays off below this


def hnn_act_kernel(x_ref, o_ref, *, k_in, k_out, feat_axis):
    """One block of HyperbolicActivation.  `feat_axis` is the in-block axis that
    carries the hyperboloid (time + spatial) coordinates; reductions are taken
    along it so the per-row scalar chain is lane-dense when feat_axis == 0."""
    x = x_ref[...].astype(jnp.float32)
    sqrt_kin = math.sqrt(k_in)
    inv_sqrt_kout = 1.0 / math.sqrt(k_out)

    # Column-0 ("time" coordinate) mask, hoisted once (JAX does not CSE iotas).
    is_time = lax.broadcasted_iota(jnp.int32, x.shape, feat_axis) == 0
    # Time coordinate via a direct 1-row / 1-lane slice (no full-width select
    # + cross-lane reduce).
    if feat_axis == 0:
        x0 = x_ref[0:1, :].astype(jnp.float32)            # (1, bn), lane-dense
    else:
        x0 = x_ref[:, 0:1].astype(jnp.float32)            # (bm, 1)

    # ---- logmap at the K_in origin ----
    xs = jnp.where(is_time, 0.0, x)                        # spatial part; time lane = 0
    ssq = jnp.sum(xs * xs, axis=feat_axis, keepdims=True)
    inv_yn = lax.rsqrt(jnp.maximum(ssq, _MIN_NORM_SQ))     # fused sqrt + reciprocal
    z = jnp.maximum(x0 * (1.0 / sqrt_kin), 1.0 + EPS)
    # acosh(z) in the cancellation-safe sqrt((z-1)(z+1)) form (accurate near z=1).
    acosh = jnp.log(z + jnp.sqrt((z - 1.0) * (z + 1.0)))
    scale = (sqrt_kin * acosh) * inv_yn

    # ---- ReLU in the tangent space.  xs's time lane is already 0 and ReLU
    #      preserves it, so proj_tan0 at the K_out origin is a no-op here. ----
    u = jnp.maximum(scale * xs, 0.0)

    # ---- expmap at the K_out origin, then proj onto the K_out hyperboloid ----
    un_sq = jnp.maximum(jnp.sum(u * u, axis=feat_axis, keepdims=True), _MIN_NORM_SQ)
    theta = jnp.sqrt(un_sq) * inv_sqrt_kout
    # sinh(theta)/theta: a single exp (EUP) + exact per-row divides; the wide
    # series guard removes the e - 1/e cancellation band entirely.
    e = jnp.exp(theta)
    sinh = 0.5 * (e - 1.0 / e)
    s2t = jnp.where(theta < 3e-2, 1.0 + theta * theta * (1.0 / 6.0), sinh / theta)
    # spatial part of expmap0: sqrtK * sinh(theta) * u / ||u|| == s2t * u
    out_s = s2t * u                                        # time lane stays 0 here
    # ||spatial||^2 of the output == s2t^2 * ||u||^2 -> no third full-width reduce.
    sp = (s2t * s2t) * un_sq
    out_0 = jnp.sqrt(k_out + sp)                           # proj: time = sqrt(K + ||s||^2)
    o_ref[...] = jnp.where(is_time, out_0, out_s).astype(o_ref.dtype)


def _round_up(v, m):
    return ((v + m - 1) // m) * m


def _pick_batch_tile(batch, d, align):
    """Largest batch tile that (a) keeps the double-buffered in+out windows under
    the VMEM budget, (b) satisfies the TPU block divisibility constraint, and
    (c) leaves >= 4 grid steps when the batch allows, so the 'parallel' grid
    axis can shard across v7x's two TensorCores."""
    cap = _WINDOW_BUDGET_BYTES // (2 * 2 * d * 4)     # 2 buffers x (in+out) x f32
    cap = max((cap // align) * align, align)
    target = _round_up(max(-(-batch // 4), 1), align)  # ~batch/4, aligned
    bm = min(cap, target)
    if bm >= batch:
        return batch        # one full-batch block (full-extent block dims are legal)
    return bm


def hnn_layer(x, W=None, b=None, *, k_lin=1.0, k_in=1.0, k_out=0.5,
              block_batch=None):
    """Matches HNNLayer.forward: the HyperbolicLinear(W, b) result is discarded by
    the reference module before being returned, so W / b / k_lin are accepted for
    interface parity but unused (and the dead branch is not executed)."""
    # TODO(synk): the discarded HyperbolicLinear branch (training-mode dropout on W,
    # Minkowski matvec, parallel transport, bias expmap and its torch prints) is
    # intentionally not reproduced -- it does not affect the returned value.
    del W, b, k_lin
    B, D = x.shape
    k_in = float(k_in)
    k_out = float(k_out)

    itemsize = jnp.dtype(x.dtype).itemsize
    cost = pl.CostEstimate(flops=20 * B * D,
                           transcendentals=9 * B,
                           bytes_accessed=2 * B * D * itemsize)
    cparams = pltpu.CompilerParams(
        dimension_semantics=("parallel",),          # megacore split of the batch axis
        vmem_limit_bytes=_VMEM_LIMIT_BYTES)
    # Note: if the batch tile ends up very small (wide D + VMEM cap + 2-TC split),
    # pipeline_mode=pl.Buffered(3) on the input BlockSpec is the next knob; at the
    # tile sizes picked here default double buffering already hides the DMA.

    if D <= _FEATURE_MAJOR_MAX_D:
        # Small feature dim: batch on lanes so per-row norms / acosh / exp run on
        # lane-dense (1, bn) vregs and stores are lane-dense.  The transposes are
        # plain XLA ops; a feature-major producer can feed (D, B) directly.
        bn = block_batch or _pick_batch_tile(B, D, align=128)
        xt = jnp.swapaxes(x, 0, 1)                                   # (D, B)
        kern = functools.partial(hnn_act_kernel, k_in=k_in, k_out=k_out,
                                 feat_axis=0)
        out_t = pl.pallas_call(
            kern,
            out_shape=jax.ShapeDtypeStruct((D, B), x.dtype),
            grid_spec=pltpu.PrefetchScalarGridSpec(
                num_scalar_prefetch=0,
                grid=(pl.cdiv(B, bn),),
                in_specs=[pl.BlockSpec((D, bn), lambda i: (0, i))],
                out_specs=pl.BlockSpec((D, bn), lambda i: (0, i))),
            compiler_params=cparams,
            cost_estimate=cost,
        )(xt)
        return jnp.swapaxes(out_t, 0, 1)

    # Wide feature dim: batch-major tiles, HBM-bandwidth-bound regime.
    bm = block_batch or _pick_batch_tile(B, D, align=8)
    kern = functools.partial(hnn_act_kernel, k_in=k_in, k_out=k_out, feat_axis=1)
    return pl.pallas_call(
        kern,
        out_shape=jax.ShapeDtypeStruct((B, D), x.dtype),
        grid_spec=pltpu.PrefetchScalarGridSpec(
            num_scalar_prefetch=0,
            grid=(pl.cdiv(B, bm),),
            in_specs=[pl.BlockSpec((bm, D), lambda i: (i, 0))],
            out_specs=pl.BlockSpec((bm, D), lambda i: (i, 0))),
        compiler_params=cparams,
        cost_estimate=cost,
    )(x)


def hnn_activation_ref(x, k_in, k_out):
    """Pure-JAX reference of the live HyperbolicActivation path (HGCN hyperboloid
    maps with the standard clamps); used only for the self-check in __main__."""
    x = x.astype(jnp.float32)
    sqrt_kin = math.sqrt(k_in)
    sqrt_kout = math.sqrt(k_out)
    is_time = jnp.arange(x.shape[1])[None, :] == 0
    # logmap at the K_in origin
    x0 = x[:, :1]
    xs = jnp.where(is_time, 0.0, x)
    yn = jnp.maximum(jnp.sqrt(jnp.sum(xs * xs, axis=-1, keepdims=True)), MIN_NORM)
    z = jnp.maximum(x0 / sqrt_kin, 1.0 + EPS)
    xt = sqrt_kin * jnp.arccosh(z) / yn * xs
    # ReLU + proj_tan at the K_out origin
    ut = jnp.where(is_time, 0.0, jnp.maximum(xt, 0.0))
    # expmap at the K_out origin + proj
    un = jnp.maximum(jnp.sqrt(jnp.sum(ut * ut, axis=-1, keepdims=True)), MIN_NORM)
    spatial = jnp.where(is_time, 0.0, sqrt_kout * jnp.sinh(un / sqrt_kout) * ut / un)
    time = jnp.sqrt(k_out + jnp.sum(spatial * spatial, axis=-1, keepdims=True))
    return jnp.where(is_time, time, spatial)


# --------------------------------------- main ---------------------------------------
if __name__ == "__main__":
    key = jax.random.PRNGKey(0)
    B, in_dim, out_dim = 16, 32, 16
    K_LIN, K_IN, K_OUT = 1.0, 1.0, 0.5

    kx, kw = jax.random.split(key)

    # Deterministic input: random spatial features projected onto the K_IN
    # hyperboloid (feature 0 is the time coordinate).
    feats = 0.1 * jax.random.normal(kx, (B, in_dim), dtype=jnp.float32)
    col = jnp.arange(in_dim)[None, :]
    feats = jnp.where(col == 0, 0.0, feats)
    x0 = jnp.sqrt(K_IN + jnp.sum(feats * feats, axis=-1, keepdims=True))
    x = jnp.where(col == 0, x0, feats)

    # Parameters of the (dead) HyperbolicLinear branch -- Xavier-uniform(gain=sqrt(2))
    # W and zero bias, exactly as _init_params; kept only for interface parity.
    bound = math.sqrt(2.0) * math.sqrt(6.0 / (in_dim + out_dim))
    W = jax.random.uniform(kw, (out_dim, in_dim), minval=-bound, maxval=bound,
                           dtype=jnp.float32)
    bvec = jnp.zeros((out_dim,), jnp.float32)

    out = hnn_layer(x, W, bvec, k_lin=K_LIN, k_in=K_IN, k_out=K_OUT)
    out = jax.block_until_ready(out)

    ref = hnn_activation_ref(x, K_IN, K_OUT)

    assert out.shape == (B, in_dim)
    assert bool(jnp.all(jnp.isfinite(out)))
    assert bool(jnp.allclose(out, ref, rtol=1e-3, atol=1e-3)), \
        float(jnp.max(jnp.abs(out - ref)))
    # Output must lie on the K_OUT hyperboloid: x0^2 - ||x_spatial||^2 = K_OUT.
    residual = out[:, 0] ** 2 - jnp.sum(out[:, 1:] ** 2, axis=-1)
    assert bool(jnp.allclose(residual, K_OUT, atol=1e-4))
    print("KERNEL_OK")
</pallas_src>

<mosaic_0001>
module attributes {stable_mosaic.version = 11 : i64} {
  func.func @hnn_act_kernel(%arg0: i32, %arg1: memref<32x16xf32, #tpu.memory_space<vmem>>, %arg2: memref<32x16xf32, #tpu.memory_space<vmem>>) attributes {dimension_semantics = [#tpu.dimension_semantics<parallel>], iteration_bounds = array<i64: 1>, scalar_prefetch = 0 : i64, scratch_operands = 0 : i64, tpu.core_type = #tpu.core_type<tc>, window_params = [{transform_indices = @transform_0, window_bounds = array<i64: 32, 16>}, {transform_indices = @transform_1, window_bounds = array<i64: 32, 16>}]} {
    %c0 = arith.constant 0 : index
    %c0_0 = arith.constant 0 : index
    %0 = vector.load %arg1[%c0, %c0_0] : memref<32x16xf32, #tpu.memory_space<vmem>>, vector<32x16xf32>
    %1 = tpu.iota {dimensions = array<i32: 0>} : vector<32x16xi32>
    %c0_i32 = arith.constant 0 : i32
    %2 = vector.broadcast %c0_i32 : i32 to vector<32x16xi32>
    %3 = arith.cmpi eq, %1, %2 : vector<32x16xi32>
    %c0_1 = arith.constant 0 : index
    %c0_2 = arith.constant 0 : index
    %4 = vector.load %arg1[%c0_1, %c0_2] : memref<32x16xf32, #tpu.memory_space<vmem>>, vector<1x16xf32>
    %cst = arith.constant 0.000000e+00 : f32
    %5 = vector.broadcast %cst : f32 to vector<32x16xf32>
    %6 = arith.select %3, %5, %0 : vector<32x16xi1>, vector<32x16xf32>
    %7 = arith.mulf %6, %6 : vector<32x16xf32>
    %cst_3 = arith.constant dense<0.000000e+00> : vector<16xf32>
    %8 = vector.multi_reduction <add>, %7, %cst_3 [0] : vector<32x16xf32> to vector<16xf32>
    %9 = vector.shape_cast %8 : vector<16xf32> to vector<1x16xf32>
    %cst_4 = arith.constant 1.000000e-30 : f32
    %10 = vector.broadcast %cst_4 : f32 to vector<1x16xf32>
    %11 = arith.maximumf %9, %10 : vector<1x16xf32>
    %12 = math.rsqrt %11 : vector<1x16xf32>
    %cst_5 = arith.constant 1.000000e+00 : f32
    %13 = vector.broadcast %cst_5 : f32 to vector<1x16xf32>
    %14 = arith.mulf %4, %13 : vector<1x16xf32>
    %cst_6 = arith.constant 1.00000012 : f32
    %15 = vector.broadcast %cst_6 : f32 to vector<1x16xf32>
    %16 = arith.maximumf %14, %15 : vector<1x16xf32>
    %cst_7 = arith.constant 1.000000e+00 : f32
    %17 = vector.broadcast %cst_7 : f32 to vector<1x16xf32>
    %18 = arith.subf %16, %17 : vector<1x16xf32>
    %cst_8 = arith.constant 1.000000e+00 : f32
    %19 = vector.broadcast %cst_8 : f32 to vector<1x16xf32>
    %20 = arith.addf %16, %19 : vector<1x16xf32>
    %21 = arith.mulf %18, %20 : vector<1x16xf32>
    %22 = math.sqrt %21 : vector<1x16xf32>
    %23 = arith.addf %16, %22 : vector<1x16xf32>
    %24 = math.log %23 : vector<1x16xf32>
    %cst_9 = arith.constant 1.000000e+00 : f32
    %25 = vector.broadcast %cst_9 : f32 to vector<1x16xf32>
    %26 = arith.mulf %25, %24 : vector<1x16xf32>
    %27 = arith.mulf %26, %12 : vector<1x16xf32>
    %28 = vector.broadcast %27 : vector<1x16xf32> to vector<32x16xf32>
    %29 = arith.mulf %28, %6 : vector<32x16xf32>
    %cst_10 = arith.constant 0.000000e+00 : f32
    %30 = vector.broadcast %cst_10 : f32 to vector<32x16xf32>
    %31 = arith.maximumf %29, %30 : vector<32x16xf32>
    %32 = arith.mulf %31, %31 : vector<32x16xf32>
    %cst_11 = arith.constant dense<0.000000e+00> : vector<16xf32>
    %33 = vector.multi_reduction <add>, %32, %cst_11 [0] : vector<32x16xf32> to vector<16xf32>
    %34 = vector.shape_cast %33 : vector<16xf32> to vector<1x16xf32>
    %cst_12 = arith.constant 1.000000e-30 : f32
    %35 = vector.broadcast %cst_12 : f32 to vector<1x16xf32>
    %36 = arith.maximumf %34, %35 : vector<1x16xf32>
    %37 = math.sqrt %36 : vector<1x16xf32>
    %cst_13 = arith.constant 1.41421354 : f32
    %38 = vector.broadcast %cst_13 : f32 to vector<1x16xf32>
    %39 = arith.mulf %37, %38 : vector<1x16xf32>
    %40 = math.exp %39 : vector<1x16xf32>
    %cst_14 = arith.constant 1.000000e+00 : f32
    %41 = vector.broadcast %cst_14 : f32 to vector<1x16xf32>
    %42 = arith.divf %41, %40 : vector<1x16xf32>
    %43 = arith.subf %40, %42 : vector<1x16xf32>
    %cst_15 = arith.constant 5.000000e-01 : f32
    %44 = vector.broadcast %cst_15 : f32 to vector<1x16xf32>
    %45 = arith.mulf %44, %43 : vector<1x16xf32>
    %cst_16 = arith.constant 3.000000e-02 : f32
    %46 = vector.broadcast %cst_16 : f32 to vector<1x16xf32>
    %47 = arith.cmpf olt, %39, %46 : vector<1x16xf32>
    %48 = arith.mulf %39, %39 : vector<1x16xf32>
    %cst_17 = arith.constant 0.166666672 : f32
    %49 = vector.broadcast %cst_17 : f32 to vector<1x16xf32>
    %50 = arith.mulf %48, %49 : vector<1x16xf32>
    %cst_18 = arith.constant 1.000000e+00 : f32
    %51 = vector.broadcast %cst_18 : f32 to vector<1x16xf32>
    %52 = arith.addf %51, %50 : vector<1x16xf32>
    %53 = arith.divf %45, %39 : vector<1x16xf32>
    %54 = arith.select %47, %52, %53 : vector<1x16xi1>, vector<1x16xf32>
    %55 = vector.broadcast %54 : vector<1x16xf32> to vector<32x16xf32>
    %56 = arith.mulf %55, %31 : vector<32x16xf32>
    %57 = arith.mulf %54, %54 : vector<1x16xf32>
    %58 = arith.mulf %57, %36 : vector<1x16xf32>
    %cst_19 = arith.constant 5.000000e-01 : f32
    %59 = vector.broadcast %cst_19 : f32 to vector<1x16xf32>
    %60 = arith.addf %59, %58 : vector<1x16xf32>
    %61 = math.sqrt %60 : vector<1x16xf32>
    %62 = vector.shape_cast %61 : vector<1x16xf32> to vector<1x16xf32>
    %63 = vector.broadcast %62 : vector<1x16xf32> to vector<32x16xf32>
    %64 = arith.select %3, %63, %56 : vector<32x16xi1>, vector<32x16xf32>
    %c0_20 = arith.constant 0 : index
    %c0_21 = arith.constant 0 : index
    %65 = vector.load %arg2[%c0_20, %c0_21] : memref<32x16xf32, #tpu.memory_space<vmem>>, vector<32x16xf32>
    tpu.vector_store %arg2[%c0_20, %c0_21], %64 {strides = array<i32>} : memref<32x16xf32, #tpu.memory_space<vmem>>, vector<32x16xf32>,
    return
  }
  func.func @transform_0(%arg0: i32) -> (i32, i32) {
    %c0_i32 = arith.constant 0 : i32
    %c0_i32_0 = arith.constant 0 : i32
    return %c0_i32, %arg0 : i32, i32
  }
  func.func @transform_1(%arg0: i32) -> (i32, i32) {
    %c0_i32 = arith.constant 0 : i32
    %c0_i32_0 = arith.constant 0 : i32
    return %c0_i32, %arg0 : i32, i32
  }
}

</mosaic_0001>

<bundles_post_ra>
// kernel: tpu_custom_call.1
= control target key start
LH: loop header
LB: loop body
LE: loop exit
PB: predicated region body
PF: predicated region fallthrough
CT: control target
= control target key end

     0   :  { %v12_v0 = vlaneseq  ;;  %vm30_vm0 = vcmask 130048   ;;  %s212_s0 = inlined_call_operand.vmem [shape: f32[32,16], index: 0, kind: input, shape index: {}]   ;;  %s213_s1 = inlined_call_operand.vmem [shape: f32[32,16], index: 1, kind: output, shape index: {}]  }
   0x1   :  { %v9_v1 = vld [vmem:[%s212_s0 + $0x8] sm:$0xff]  ;;  %v10_v2 = vld [vmem:[%s212_s0 + $0x10] sm:$0xff]  ;;  %v8_v3 = vld [vmem:[%s212_s0] sm:$0xff] }
   0x2   :  { %v174_v4 = vshrl.u32 %v12_v0, 7  ;;  %v21_v5 = vld [vmem:[%s212_s0] sm:$0x1]  ;;  %v27_v6 = vmul.f32 %v9_v1, %v9_v1  ;;  %v11_v7 = vld [vmem:[%s212_s0 + $0x18] sm:$0xff]  ;;  %v28_v9 = vmul.f32 %v10_v2, %v10_v2 }
   0x3   :  { %v46_v8 = vmax.f32 %v21_v5, 1.0000001  ;;  %v29_v14 = vmul.f32 %v11_v7, %v11_v7 }
   0x4   :  { %vm17_vm1 = vcmp.eq.s32.totalorder %v174_v4, 0  ;;  %v32_v15 = vsel %vm30_vm0, %v27_v6, 0.0  ;;  %v34_v18 = vsel %vm30_vm0, %v28_v9, 0.0  ;;  %v63_v39 = vsub.s32 0, %v174_v4 }
   0x5   :  { %v22_v10 = vsel %vm17_vm1, 0.0, %v8_v3  ;;  %v138_v11 = vadd.f32 -1.0, %v46_v8  ;;  %v48_v12 = vadd.f32 1.0, %v46_v8  ;;  %v36_v20 = vsel %vm30_vm0, %v29_v14, 0.0 }
   0x6   :  { %v26_v13 = vmul.f32 %v22_v10, %v22_v10 }
   0x7   :  { %v49_v16 = vmul.f32 %v138_v11, %v48_v12 }
   0x8   :  { %v31_v17 = vsel %vm30_vm0, %v26_v13, 0.0 }
   0x9   :  { %v33_v19 = vadd.f32 %v32_v15, %v31_v17  ;;  %139 = vrsqrt.f32 %v49_v16  ;;  %vm52_vm2 = vcmp.eq.f32.partialorder %v49_v16, inf  ;;  %v55_v28 = vand.u32 2147483648, %v49_v16 }
   0xa   :  { %vm54_vm3 = vcmp.eq.f32.partialorder %v49_v16, 0.0 }
   0xb   :  { %v35_v21 = vadd.f32 %v34_v18, %v33_v19 }
   0xd   :  { %v37_v22 = vadd.f32 %v36_v20, %v35_v21 }
   0xf   :  { %v38_v23 = vrot.slane %v37_v22, 4 }
  0x11   :  { %v39_v24 = vadd.f32 %v38_v23, %v37_v22 }
  0x13   :  { %v40_v25 = vrot.slane %v39_v24, 2 }
  0x15   :  { %v41_v26 = vadd.f32 %v40_v25, %v39_v24 }
  0x16   :  { %v140_v27 = vpop.eup %139 }
  0x17   :  { %v42_v29 = vrot.slane %v41_v26, 1  ;;  %v51_v30 = vmul.f32 %v140_v27, %v49_v16 }
  0x19   :  { %v43_v31 = vadd.f32 %v42_v29, %v41_v26  ;;  %v53_v32 = vsel %vm52_vm2, %v49_v16, %v51_v30 }
  0x1a   :  { %v56_v33 = vsel %vm54_vm3, %v55_v28, %v53_v32 }
  0x1b   :  { %v44_v34 = vmax.f32 %v43_v31, 1e-30  ;;  %v57_v35 = vadd.f32 %v56_v33, %v46_v8 }
  0x1d   :  { %141 = vrsqrt.f32 %v44_v34 }
  0x1e   :  { %143 = vlog2.f32 %v57_v35 }
  0x2a   :  { %v142_v36 = vpop.eup %141 }
  0x2b   :  { %v144_v37 = vpop.eup %143 }
  0x2c   :  { %v59_v38 = vmul.f32 0.6931472, %v144_v37 }
  0x2e   :  { %v60_v40 = vmul.f32 %v142_v36, %v59_v38 }
  0x30   :  { %v64_v41 = vrot.slane %v60_v40, %v63_v39 }
  0x32   :  { %v65_v42 = vmul.f32 %v64_v41, %v22_v10  ;;  %v66_v43 = vmul.f32 %v64_v41, %v9_v1  ;;  %v67_v44 = vmul.f32 %v64_v41, %v10_v2  ;;  %v68_v45 = vmul.f32 %v64_v41, %v11_v7 }
  0x34   :  { %v69_v46 = vmax.f32 %v65_v42, 0.0  ;;  %v70_v47 = vmax.f32 %v66_v43, 0.0  ;;  %v71_v48 = vmax.f32 %v67_v44, 0.0  ;;  %v72_v49 = vmax.f32 %v68_v45, 0.0 }
  0x36   :  { %v73_v50 = vmul.f32 %v69_v46, %v69_v46  ;;  %v74_v51 = vmul.f32 %v70_v47, %v70_v47  ;;  %v75_v52 = vmul.f32 %v71_v48, %v71_v48  ;;  %v76_v53 = vmul.f32 %v72_v49, %v72_v49 }
  0x38   :  { %v77_v54 = vsel %vm30_vm0, %v73_v50, 0.0  ;;  %v78_v55 = vsel %vm30_vm0, %v74_v51, 0.0  ;;  %v80_v56 = vsel %vm30_vm0, %v75_v52, 0.0  ;;  %v82_v58 = vsel %vm30_vm0, %v76_v53, 0.0 }
  0x39   :  { %v79_v57 = vadd.f32 %v78_v55, %v77_v54 }
  0x3b   :  { %v81_v59 = vadd.f32 %v80_v56, %v79_v57 }
  0x3d   :  { %v83_v60 = vadd.f32 %v82_v58, %v81_v59 }
  0x3f   :  { %v84_v61 = vrot.slane %v83_v60, 4 }
  0x41   :  { %v85_v62 = vadd.f32 %v84_v61, %v83_v60 }
  0x43   :  { %v86_v63 = vrot.slane %v85_v62, 2 }
  0x45   :  { %v87_v0 = vadd.f32 %v86_v63, %v85_v62 }
  0x47   :  { %v88_v1 = vrot.slane %v87_v0, 1 }
  0x49   :  { %v89_v2 = vadd.f32 %v88_v1, %v87_v0 }
  0x4b   :  { %v90_v3 = vmax.f32 %v89_v2, 1e-30 }
  0x4d   :  { %145 = vrsqrt.f32 %v90_v3  ;;  %vm93_vm4 = vcmp.eq.f32.partialorder %v90_v3, inf  ;;  %v96_v6 = vand.u32 2147483648, %v90_v3  ;;  %vm95_vm5 = vcmp.eq.f32.partialorder %v90_v3, 0.0 }
  0x5a   :  { %v146_v5 = vpop.eup %145 }
  0x5b   :  { %v92_v7 = vmul.f32 %v146_v5, %v90_v3 }
  0x5d   :  { %v94_v8 = vsel %vm93_vm4, %v90_v3, %v92_v7 }
  0x5e   :  { %v97_v9 = vsel %vm95_vm5, %v96_v6, %v94_v8 }
  0x5f   :  { %v98_v10 = vmul.f32 1.4142135, %v97_v9 }
  0x61   :  { %v99_v11 = vmul.f32 1.442695, %v98_v10  ;;  %v106_v13 = vmul.f32 %v98_v10, %v98_v10  ;;  %vm105_vm6 = vcmp.lt.f32.partialorder %v98_v10, 0.03 }
  0x63   :  { %147 = vpow2.f32 %v99_v11  ;;  %v107_v14 = vmul.f32 0.16666667, %v106_v13 }
  0x65   :  { %v108_v19 = vadd.f32 1.0, %v107_v14 }
  0x70   :  { %v148_v12 = vpop.eup %147 }
  0x71   :  { %149 = vrcp.f32 %v148_v12 }
  0x72   :  { %151 = vrcp.f32 %v98_v10 }
  0x7e   :  { %v150_v15 = vpop.eup %149 }
  0x7f   :  { %v103_v16 = vsub.f32 %v148_v12, %v150_v15  ;;  %v152_v17 = vpop.eup %151 }
  0x81   :  { %v104_v18 = vmul.f32 0.5, %v103_v16 }
  0x83   :  { %v110_v20 = vmul.f32 %v152_v17, %v104_v18 }
  0x85   :  { %v111_v21 = vsel %vm105_vm6, %v108_v19, %v110_v20 }
  0x86   :  { %v116_v22 = vmul.f32 %v111_v21, %v111_v21  ;;  %v113_v23 = vmul.f32 %v111_v21, %v70_v47  ;;  %v114_v24 = vmul.f32 %v111_v21, %v71_v48  ;;  %v115_v25 = vmul.f32 %v111_v21, %v72_v49 }
  0x87   :  { %v112_v30 = vmul.f32 %v111_v21, %v69_v46 }
  0x88   :  { %v117_v26 = vmul.f32 %v116_v22, %v90_v3  ;;  %131 = vst.msk [vmem:[%s213_s1 + $0x8] sm:$0xff] %vm30_vm0, %v113_v23  ;;  %132 = vst.msk [vmem:[%s213_s1 + $0x10] sm:$0xff] %vm30_vm0, %v114_v24 }
  0x89   :  { %133 = vst.msk [vmem:[%s213_s1 + $0x18] sm:$0xff] %vm30_vm0, %v115_v25 }
  0x8a   :  { %v118_v27 = vadd.f32 0.5, %v117_v26 }
  0x8c   :  { %153 = vrsqrt.f32 %v118_v27  ;;  %vm121_vm7 = vcmp.eq.f32.partialorder %v118_v27, inf  ;;  %v124_v29 = vand.u32 2147483648, %v118_v27  ;;  %vm123_vm8 = vcmp.eq.f32.partialorder %v118_v27, 0.0 }
  0x99   :  { %v154_v28 = vpop.eup %153 }
  0x9a   :  { %v120_v31 = vmul.f32 %v154_v28, %v118_v27 }
  0x9c   :  { %v122_v32 = vsel %vm121_vm7, %v118_v27, %v120_v31 }
  0x9d   :  { %v125_v33 = vsel %vm123_vm8, %v124_v29, %v122_v32 }
  0x9e   :  { %v126_v34 = vsel %vm17_vm1, %v125_v33, %v112_v30 }
  0x9f   :  { %130 = vst.msk [vmem:[%s213_s1] sm:$0xff] %vm30_vm0, %v126_v34 }

</bundles_post_ra>
